<compile_context>
chip_gen: v7x
topology: tpu7x:2x2x1
jax: 0.10.0
libtpu: 0.0.40
codegen_flags: <defaults>
</compile_context>

<pallas_src>
import functools

import jax
import jax.numpy as jnp
import numpy as np
from jax import lax
from jax.experimental import pallas as pl
from jax.experimental.pallas import tpu as pltpu

_LANE = 128
_VMEM_LIMIT = 48 * 1024 * 1024          # safe on v5e/v6e (128 MiB) and v7x (64 MiB)
_TILE_BYTE_BUDGET = 12 * 1024 * 1024    # double-buffered streaming tiles budget


def _round_up(x, m):
    return ((x + m - 1) // m) * m


def _pick_row_tile(n_pad):
    # 256-row blocks match the 256x256 MXU (v6e/v7x) but only when they still
    # leave >=2 blocks on the parallel axis (keeps both v7x TensorCores busy).
    if n_pad % 256 == 0 and n_pad >= 512:
        return 256
    return 128


def _pick_k_tile(n_pad, cap):
    """Largest multiple of 128 that divides n_pad and is <= cap."""
    cap = max(_LANE, min(cap, n_pad))
    best = _LANE
    t = _LANE
    while t <= cap:
        if n_pad % t == 0:
            best = t
        t += _LANE
    return best


# ----------------------------------------------------------------------------
# Kernel 1: support_scaled = diag(d) @ (X @ W)
#   no reduction axis: full weight stays resident in VMEM; row scale fused in.
# ----------------------------------------------------------------------------
def _support_kernel(x_ref, w_ref, d_ref, o_ref):
    s = jnp.dot(x_ref[...], w_ref[...], preferred_element_type=jnp.float32)
    o_ref[...] = (d_ref[...] * s).astype(o_ref.dtype)


def pallas_scaled_support(x, w, d):
    n_pad, f_in = x.shape
    f_out = w.shape[1]
    tm = _pick_row_tile(n_pad)
    return pl.pallas_call(
        _support_kernel,
        out_shape=jax.ShapeDtypeStruct((n_pad, f_out), jnp.float32),
        grid_spec=pltpu.PrefetchScalarGridSpec(
            num_scalar_prefetch=0,
            grid=(n_pad // tm,),
            in_specs=[
                pl.BlockSpec((tm, f_in), lambda i: (i, 0)),     # X rows
                pl.BlockSpec((f_in, f_out), lambda i: (0, 0)),  # full weight
                pl.BlockSpec((tm, 1), lambda i: (i, 0)),        # d (row scale)
            ],
            out_specs=pl.BlockSpec((tm, f_out), lambda i: (i, 0)),
        ),
        compiler_params=pltpu.CompilerParams(
            dimension_semantics=("parallel",),
            vmem_limit_bytes=_VMEM_LIMIT,
        ),
    )(x, w, d)


# ----------------------------------------------------------------------------
# Kernel 2: d = ((A + l*I).sum(axis=1)) ** -0.5, inf -> 0      shape (N, 1)
#   accumulates directly into the resident output block; rsqrt on the EUP.
# ----------------------------------------------------------------------------
def _degree_kernel(adj_ref, o_ref, *, l):
    k = pl.program_id(1)

    @pl.when(k == 0)
    def _():
        o_ref[...] = jnp.zeros_like(o_ref)

    o_ref[...] += jnp.sum(adj_ref[...], axis=1, keepdims=True)

    @pl.when(k == pl.num_programs(1) - 1)
    def _():
        s = o_ref[...] + jnp.float32(l)  # self-loop contribution l
        # s ** -0.5 with inf -> 0  ==  rsqrt(s) guarded for s == 0
        o_ref[...] = jnp.where(s > 0, lax.rsqrt(s), jnp.float32(0.0))


def pallas_degree_inv_sqrt(adj, l):
    n_pad = adj.shape[0]
    tm = _pick_row_tile(n_pad)
    cap = _TILE_BYTE_BUDGET // (8 * tm)          # 2 buffers * 4 bytes * tm * tk
    tk = _pick_k_tile(n_pad, min(4096, cap))
    return pl.pallas_call(
        functools.partial(_degree_kernel, l=float(l)),
        out_shape=jax.ShapeDtypeStruct((n_pad, 1), jnp.float32),
        grid_spec=pltpu.PrefetchScalarGridSpec(
            num_scalar_prefetch=0,
            grid=(n_pad // tm, n_pad // tk),
            in_specs=[pl.BlockSpec((tm, tk), lambda i, k: (i, k))],
            out_specs=pl.BlockSpec((tm, 1), lambda i, k: (i, 0)),
        ),
        compiler_params=pltpu.CompilerParams(
            dimension_semantics=("parallel", "arbitrary"),
            vmem_limit_bytes=_VMEM_LIMIT,
        ),
    )(adj)


# ----------------------------------------------------------------------------
# Kernel 3: out = diag(d) @ (A @ support_scaled) + bias
#   A streamed exactly once (full F_out per output block); adjacency tile feeds
#   the MXU directly; row scale + bias applied once in the k==last epilogue.
# ----------------------------------------------------------------------------
def _aggregate_kernel(adj_ref, d_ref, sup_ref, bias_ref, o_ref):
    k = pl.program_id(1)

    @pl.when(k == 0)
    def _():
        o_ref[...] = jnp.zeros_like(o_ref)

    o_ref[...] += jnp.dot(
        adj_ref[...], sup_ref[...], preferred_element_type=jnp.float32
    )

    @pl.when(k == pl.num_programs(1) - 1)
    def _():
        o_ref[...] = o_ref[...] * d_ref[...] + bias_ref[...]


def pallas_aggregate(adj, d, support_scaled, bias):
    n_pad = adj.shape[0]
    f_out = support_scaled.shape[1]
    tm = _pick_row_tile(n_pad)
    # adjacency + support double buffers under the streaming budget
    cap = _TILE_BYTE_BUDGET // (8 * (tm + f_out))
    tk = _pick_k_tile(n_pad, min(2048, cap))
    return pl.pallas_call(
        _aggregate_kernel,
        out_shape=jax.ShapeDtypeStruct((n_pad, f_out), jnp.float32),
        grid_spec=pltpu.PrefetchScalarGridSpec(
            num_scalar_prefetch=0,
            grid=(n_pad // tm, n_pad // tk),          # F_out whole: A read once
            in_specs=[
                pl.BlockSpec((tm, tk), lambda i, k: (i, k)),     # adjacency
                pl.BlockSpec((tm, 1), lambda i, k: (i, 0)),      # d (row scale)
                pl.BlockSpec((tk, f_out), lambda i, k: (k, 0)),  # scaled support
                pl.BlockSpec((1, f_out), lambda i, k: (0, 0)),   # bias
            ],
            out_specs=pl.BlockSpec((tm, f_out), lambda i, k: (i, 0)),
        ),
        compiler_params=pltpu.CompilerParams(
            dimension_semantics=("parallel", "arbitrary"),
            vmem_limit_bytes=_VMEM_LIMIT,
        ),
    )(adj, d, support_scaled, bias)


# ----------------------------------------------------------------------------
# GCNConv_s forward (wrapper): zero-pads N to a multiple of 128, slices back.
# ----------------------------------------------------------------------------
def gcn_conv_s_forward(adjacency, input_feature, weight, bias=None, l=1.0):
    adjacency = jnp.asarray(adjacency, jnp.float32)
    input_feature = jnp.asarray(input_feature, jnp.float32)
    weight = jnp.asarray(weight, jnp.float32)

    n = adjacency.shape[0]
    f_out = weight.shape[1]
    n_pad = _round_up(n, _LANE)

    adj_p = jnp.pad(adjacency, ((0, n_pad - n), (0, n_pad - n)))
    x_p = jnp.pad(input_feature, ((0, n_pad - n), (0, 0)))

    if bias is None:
        bias2d = jnp.zeros((1, f_out), jnp.float32)
    else:
        bias2d = jnp.asarray(bias, jnp.float32).reshape(1, f_out)

    # d = ((A + l*I).sum(1)) ** -0.5, inf -> 0          (one streaming pass over A)
    d = pallas_degree_inv_sqrt(adj_p, l)                 # (n_pad, 1)
    # support_scaled = diag(d) @ (X @ W)                 (column-side D folded in)
    support_scaled = pallas_scaled_support(x_p, weight, d)
    # out = diag(d) @ A @ support_scaled + bias          (A streamed exactly once)
    out = pallas_aggregate(adj_p, d, support_scaled, bias2d)
    return out[:n]


# ----------------------------------------------------------------------------
# Parameter init (mimics kaiming_uniform_ on weight, zeros on bias)
# ----------------------------------------------------------------------------
def init_params(key, input_dim, output_dim, use_bias=True):
    # torch kaiming_uniform_ default: gain=sqrt(2), fan_in = weight.size(1) = output_dim
    bound = float(np.sqrt(2.0) * np.sqrt(3.0 / output_dim))
    weight = jax.random.uniform(
        key, (input_dim, output_dim), jnp.float32, minval=-bound, maxval=bound
    )
    bias = jnp.zeros((output_dim,), jnp.float32) if use_bias else None
    return weight, bias


def _reference(adjacency, x, weight, bias, l):
    # pure-JAX reference of the exact PyTorch semantics
    n = adjacency.shape[0]
    support = x @ weight
    SUM = (adjacency + l * jnp.eye(n, dtype=jnp.float32)).sum(axis=1)
    D = jnp.power(jnp.diag(SUM), -0.5)
    D = jnp.where(jnp.isinf(D), 0.0, D)
    adj_norm = D @ adjacency @ D
    out = adj_norm @ support
    if bias is not None:
        out = out + bias
    return out


if __name__ == "__main__":
    key = jax.random.PRNGKey(0)
    cases = [
        dict(n=512, f_in=128, f_out=128),  # tile-aligned path (256-row blocks)
        dict(n=200, f_in=96, f_out=64),    # padding + non-128 feature dims path
    ]
    for c in cases:
        key, k_w, k_x, k_a = jax.random.split(key, 4)
        n, f_in, f_out = c["n"], c["f_in"], c["f_out"]

        weight, bias = init_params(k_w, f_in, f_out, use_bias=True)
        x = jax.random.normal(k_x, (n, f_in), jnp.float32)
        # random symmetric 0/1 adjacency, no self loops
        a = (jax.random.uniform(k_a, (n, n)) < 0.05).astype(jnp.float32)
        adjacency = jnp.maximum(a, a.T) * (1.0 - jnp.eye(n, dtype=jnp.float32))

        out = gcn_conv_s_forward(adjacency, x, weight, bias, l=1.0)
        out = jax.block_until_ready(out)

        ref = _reference(adjacency, x, weight, bias, l=1.0)
        np.testing.assert_allclose(
            np.asarray(out), np.asarray(ref), rtol=2e-5, atol=2e-4
        )

    print("KERNEL_OK")
</pallas_src>

<mosaic_0001>
module attributes {stable_mosaic.version = 11 : i64} {
  func.func @_degree_kernel(%arg0: i32, %arg1: i32, %arg2: memref<256x512xf32, #tpu.memory_space<vmem>>, %arg3: memref<256x1xf32, #tpu.memory_space<vmem>>) attributes {dimension_semantics = [#tpu.dimension_semantics<parallel>, #tpu.dimension_semantics<arbitrary>], iteration_bounds = array<i64: 2, 1>, scalar_prefetch = 0 : i64, scratch_operands = 0 : i64, tpu.core_type = #tpu.core_type<tc>, window_params = [{transform_indices = @transform_0, window_bounds = array<i64: 256, 512>}, {transform_indices = @transform_1, window_bounds = array<i64: 256, 1>}]} {
    %c0_i32 = arith.constant 0 : i32
    %0 = arith.cmpi eq, %arg1, %c0_i32 : i32
    %1 = arith.extui %0 : i1 to i32
    %c0_i32_0 = arith.constant 0 : i32
    %2 = arith.cmpi ne, %1, %c0_i32_0 : i32
    scf.if %2 {
      %cst_8 = arith.constant 0.000000e+00 : f32
      %12 = vector.broadcast %cst_8 : f32 to vector<256x1xf32>
      %c0_9 = arith.constant 0 : index
      %c0_10 = arith.constant 0 : index
      %13 = vector.load %arg3[%c0_9, %c0_10] : memref<256x1xf32, #tpu.memory_space<vmem>>, vector<256x1xf32>
      tpu.vector_store %arg3[%c0_9, %c0_10], %12 {strides = array<i32>} : memref<256x1xf32, #tpu.memory_space<vmem>>, vector<256x1xf32>,
    } else {
    }
    %c0 = arith.constant 0 : index
    %c0_1 = arith.constant 0 : index
    %3 = vector.load %arg3[%c0, %c0_1] : memref<256x1xf32, #tpu.memory_space<vmem>>, vector<256x1xf32>
    %c0_2 = arith.constant 0 : index
    %c0_3 = arith.constant 0 : index
    %4 = vector.load %arg2[%c0_2, %c0_3] : memref<256x512xf32, #tpu.memory_space<vmem>>, vector<256x512xf32>
    %cst = arith.constant dense<0.000000e+00> : vector<256xf32>
    %5 = vector.multi_reduction <add>, %4, %cst [1] : vector<256x512xf32> to vector<256xf32>
    %6 = vector.shape_cast %5 : vector<256xf32> to vector<256x1xf32>
    %7 = arith.addf %3, %6 : vector<256x1xf32>
    %c0_4 = arith.constant 0 : index
    %c0_5 = arith.constant 0 : index
    %8 = vector.load %arg3[%c0_4, %c0_5] : memref<256x1xf32, #tpu.memory_space<vmem>>, vector<256x1xf32>
    tpu.vector_store %arg3[%c0_4, %c0_5], %7 {strides = array<i32>} : memref<256x1xf32, #tpu.memory_space<vmem>>, vector<256x1xf32>,
    %c0_i32_6 = arith.constant 0 : i32
    %9 = arith.cmpi eq, %arg1, %c0_i32_6 : i32
    %10 = arith.extui %9 : i1 to i32
    %c0_i32_7 = arith.constant 0 : i32
    %11 = arith.cmpi ne, %10, %c0_i32_7 : i32
    scf.if %11 {
      %c0_8 = arith.constant 0 : index
      %c0_9 = arith.constant 0 : index
      %12 = vector.load %arg3[%c0_8, %c0_9] : memref<256x1xf32, #tpu.memory_space<vmem>>, vector<256x1xf32>
      %cst_10 = arith.constant 1.000000e+00 : f32
      %13 = vector.broadcast %cst_10 : f32 to vector<256x1xf32>
      %14 = arith.addf %12, %13 : vector<256x1xf32>
      %cst_11 = arith.constant 0.000000e+00 : f32
      %15 = vector.broadcast %cst_11 : f32 to vector<256x1xf32>
      %16 = arith.cmpf ogt, %14, %15 : vector<256x1xf32>
      %17 = math.rsqrt %14 : vector<256x1xf32>
      %cst_12 = arith.constant 0.000000e+00 : f32
      %18 = vector.broadcast %cst_12 : f32 to vector<256x1xf32>
      %19 = arith.select %16, %17, %18 : vector<256x1xi1>, vector<256x1xf32>
      %c0_13 = arith.constant 0 : index
      %c0_14 = arith.constant 0 : index
      %20 = vector.load %arg3[%c0_13, %c0_14] : memref<256x1xf32, #tpu.memory_space<vmem>>, vector<256x1xf32>
      tpu.vector_store %arg3[%c0_13, %c0_14], %19 {strides = array<i32>} : memref<256x1xf32, #tpu.memory_space<vmem>>, vector<256x1xf32>,
    } else {
    }
    return
  }
  func.func @transform_0(%arg0: i32, %arg1: i32) -> (i32, i32) {
    %c0_i32 = arith.constant 0 : i32
    return %arg0, %arg1 : i32, i32
  }
  func.func @transform_1(%arg0: i32, %arg1: i32) -> (i32, i32) {
    %c0_i32 = arith.constant 0 : i32
    %c0_i32_0 = arith.constant 0 : i32
    return %arg0, %c0_i32 : i32, i32
  }
}

</mosaic_0001>

<bundles_post_ra>
// kernel: tpu_custom_call.1
= control target key start
LH: loop header
LB: loop body
LE: loop exit
PB: predicated region body
PF: predicated region fallthrough
CT: control target
= control target key end

     0   :  { %6 = vsyncpa [#allocation3], 0  ;;  %s1674_s0 = inlined_call_operand.hbm [shape: f32[512,512], index: 0, kind: input, shape index: {}]   ;;  %s1675_s1 = inlined_call_operand.vmem [shape: f32[512,1], index: 1, kind: output, shape index: {}]  }
   0x1   :  { %8 = vsyncpa [#allocation3 + $0x1], 0  ;;  %s1087_s6 = smov 0   ;;  %s1089_s7 = smov 0  }
   0x2   :  { %s1091_s8 = smov 0   ;;  %s1093_s9 = smov 0  }
   0x3   :  { %s1095_s10 = smov 0   ;;  %s1097_s11 = smov 0  }
   0x4 LB: > { %s853_s12 = sadd.s32 4294967295, %s1071_s11   ;;  %s26_s13 = sadd.s32 1, %s1067_s10  ;;  %s1071_s11 = sphi %s1097_s11, %s14_s11   ;;  %s1067_s10 = sphi %s1095_s10, %s1683_s10   ;;  %s1063_s9 = sphi %s1093_s9, %s1682_s9   ;;  %s1059_s8 = sphi %s1091_s8, %s1681_s8   ;;  %s1055_s7 = sphi %s1089_s7, %s1680_s7   ;;  %s1051_s6 = sphi %s1087_s6, %s1679_s6  }
   0x5   : > { %p28_p0 = scmp.ge.s32.totalorder %s26_s13, 2  ;;  %s35_s14 = sadd.s32 1, %s1059_s8 }
   0x6   : > { %p42_p1 = scmp.ne.s32.totalorder %s1059_s8, %s1055_s7  ;;  %p43_p2 = scmp.eq.s32.totalorder %s1071_s11, 0 }
   0x7   : > { %s1685_s13 = smov (%p28_p0, %s26_s13), 0  ;;  %p48_p4 = scmp.ne.s32.totalorder %s1055_s7, %s1051_s6 }
   0x8   : > { %p1123_p3 = por %p43_p2, %p42_p1  ;;  %s30_s16 = ssub.s32 %s1067_s10, %s1685_s13 }
   0x9   : > { %p49_p5 = scmp.eq.s32.totalorder %s853_s12, 0  ;;  %p33_p6 = scmp.eq.s32.totalorder %s30_s16, 0 }
   0xa   : > { %p875_p8 = scmp.lt.s32.totalorder %s1071_s11, 2  ;;  %s98_s19 = sand.u32 1, %s1059_s8  }
   0xb   : > { %p1130_p7 = por %p49_p5, %p48_p4  ;;  %s868_s20 = sshll.u32 %s1067_s10, 14 }
   0xc   : > { %s1136_s18 = scalar_select %p33_p6, %s1059_s8, %s35_s14  }
   0xd   : > { %s857_s21 = sshll.u32 %s98_s19, 10  ;;  %s1143_s24 = scalar_lea.hbm %s1674_s0, %s868_s20 }
   0xe   : > { %s102_s25 = scalar_lea.vmem [#allocation2], %s857_s21  ;;  %p1147_p9 = pnand %p875_p8, %p1123_p3 }
   0xf   : > { %s112_s26 = sshll.u32 %s102_s25, 4  ;;  %s1153_s28 = scalar_lea.sflag [#allocation3], %s98_s19  ;;  %s1151_s26 = int_to_ptr.vmem [resolvable:$true] %s112_s26 }
  0x10   : > { %s991_s29 = scalar_lea.hbm %s1143_s24, 16384  ;;  %p993_p11 = pneg %p1147_p9 }
  0x11   : > { %p992_p10 = scmp.ne.s32.totalorder %s1143_s24, %s991_s29  ;;  %s996_s3 = scalar_lea.hbm %s1674_s0, 32768 }
  0x12   : > { %p997_p0 = scmp.lt.u32.totalorder %s1143_s24, %s1674_s0  ;;  %p998_p1 = scmp.lt.u32.totalorder %s996_s3, %s991_s29 }
  0x13   : > { %p994_p12 = pnand %p993_p11, %p992_p10  ;;  %p1000_p3 = scmp.lt.u32.totalorder %s991_s29, %s1143_s24 }
  0x14   : > { %p999_p2 = por %p998_p1, %p997_p0 }
  0x15   : > { %p995_p13 = pneg %p994_p12 }
  0x16   : > { %p1001_p4 = por %p1000_p3, %p999_p2 }
  0x18   : > { %p1002_p5 = pnand %p1001_p4, %p995_p13 }
  0x1a   : > { %1005 = shalt.err (!%p1002_p5)
}
  0x1b   : > { %s1006_s6 = scalar_lea.vmem %s1151_s26, 16384  ;;  %s1073_s12 = smov [#allocation2]  }
  0x1c   : > { %p1007_p6 = scmp.ne.s32.totalorder %s1151_s26, %s1006_s6  ;;  %s1011_s14 = sshll.u32 %s1073_s12, 4  ;;  %s1012_s14 = int_to_ptr.vmem [resolvable:$false] %s1011_s14 }
  0x1d   : > { %s1013_s15 = scalar_lea.vmem %s1012_s14, 32768  ;;  %p1014_p12 = scmp.lt.s32.totalorder %s1151_s26, %s1012_s14 }
  0x1e   : > { %p1009_p8 = pnand %p1007_p6, %p993_p11  ;;  %p1015_p0 = scmp.lt.s32.totalorder %s1013_s15, %s1006_s6 }
  0x20   : > { %p1010_p10 = pneg %p1009_p8  ;;  %p1016_p1 = por %p1015_p0, %p1014_p12 }
  0x22   : > { %p1017_p2 = pnand %p1016_p1, %p1010_p10 }
  0x24   : > { %1020 = shalt.err (!%p1017_p2)
}
  0x25   : > { %s1074_s16 = smov 512   ;;  %s1075_s19 = smov 32  }
  0x26   : > { %874 = dma.hbm_to_vmem [thread:$0]  (!%p1147_p9), %s1143_s24, 16384, %s1151_s26, %s1153_s28, %s1074_s16, %s1074_s16, %s1075_s19  }
  0x27   : > { %p861_p11 = scmp.ge.s32.totalorder %s1071_s11, 1  ;;  %p120_p13 = scmp.lt.s32.totalorder %s1071_s11, 3 }
  0x29   : > { %p121_p3 = pnand %p861_p11, %p120_p13 }
  0x2a   : > { %s126_s20 = sand.u32 (!%p121_p3), 1, %s1055_s7  }
  0x2b   : > { %124 = sbr.rel (%p121_p3) target bundleno = 287 (0x11f), region = 24  ;;  %s862_s21 = sshll.u32 (!%p121_p3), %s126_s20, 10 }
  0x2c   : > { %s127_s22 = scalar_lea.sflag (!%p121_p3), [#allocation3], %s126_s20  ;;  %s1184_s23 = scalar_lea.vmem (!%p121_p3), [#allocation2], %s862_s21 }
  0x32   : > { %1046 = dma.done.wait (%p1130_p7), %s127_s22, 16384  }
  0x33   : > { %1048 = vsyncadd (%p1130_p7), %s127_s22, 4294950912  ;;  %s863_s24 = sshll.u32 %s1063_s9, 5  ;;  %vm161_vm0 = vcmask 7168   ;;  %v234_v0 = vld [vmem:[%s1184_s23 + $0x40] sm:$0xff]  ;;  %v235_v1 = vld [vmem:[%s1184_s23 + $0x48] sm:$0xff]  ;;  %v1076_v3 = vmov 0.0  }
  0x34   : > { %p152_p9 = scmp.lt.s32.totalorder %s863_s24, 63  ;;  %v236_v2 = vld [vmem:[%s1184_s23 + $0x50] sm:$0xff]  ;;  %v364_v4 = vadd.f32 %v235_v1, %v234_v0  ;;  %v226_v5 = vld [vmem:[%s1184_s23] sm:$0xff]  ;;  %v227_v6 = vld [vmem:[%s1184_s23 + $0x8] sm:$0xff] }
  0x35   : > { %v237_v7 = vld [vmem:[%s1184_s23 + $0x58] sm:$0xff]  ;;  %v228_v8 = vld [vmem:[%s1184_s23 + $0x10] sm:$0xff]  ;;  %v354_v9 = vadd.f32 %v227_v6, %v226_v5  ;;  %v238_v10 = vld [vmem:[%s1184_s23 + $0x60] sm:$0xff] }
  0x36   : > { %s1687_s24 = smov (!%p152_p9, %s863_s24), 63  ;;  %v365_v11 = vadd.f32 %v364_v4, %v236_v2  ;;  %v229_v12 = vld [vmem:[%s1184_s23 + $0x18] sm:$0xff]  ;;  %v239_v13 = vld [vmem:[%s1184_s23 + $0x68] sm:$0xff]  ;;  %v240_v14 = vld [vmem:[%s1184_s23 + $0x70] sm:$0xff] }
  0x37   : > { %s864_s25 = sshll.u32 %s1687_s24, 3  ;;  %v355_v15 = vadd.f32 %v354_v9, %v228_v8  ;;  %v369_v16 = vadd.f32 %v239_v13, %v238_v10  ;;  %v230_v17 = vld [vmem:[%s1184_s23 + $0x20] sm:$0xff]  ;;  %v231_v18 = vld [vmem:[%s1184_s23 + $0x28] sm:$0xff]  ;;  %v232_v19 = vld [vmem:[%s1184_s23 + $0x30] sm:$0xff] }
  0x38   : > { %s1194_s28 = scalar_lea.vmem %s1675_s1, %s864_s25  ;;  %v366_v20 = vadd.f32 %v365_v11, %v237_v7  ;;  %v241_v21 = vld [vmem:[%s1184_s23 + $0x78] sm:$0xff]  ;;  %v359_v22 = vadd.f32 %v231_v18, %v230_v17  ;;  %v246_v23 = vld [vmem:[%s1184_s23 + $0xa0] sm:$0xff]  ;;  %v247_v24 = vld [vmem:[%s1184_s23 + $0xa8] sm:$0xff] }
  0x39   : > { %164 = vst.msk [vmem:[%s1194_s28 + $0x10] sm:$0xff] %vm161_vm0, %v1076_v3  ;;  %162 = vst.msk [vmem:[%s1194_s28] sm:$0xff] %vm161_vm0, %v1076_v3  ;;  %v356_v25 = vadd.f32 %v355_v15, %v229_v12  ;;  %v370_v26 = vadd.f32 %v369_v16, %v240_v14  ;;  %v233_v27 = vld [vmem:[%s1184_s23 + $0x38] sm:$0xff]  ;;  %v248_v28 = vld [vmem:[%s1184_s23 + $0xb0] sm:$0xff]  ;;  %v379_v29 = vadd.f32 %v247_v24, %v246_v23 }
  0x3a   : > { %163 = vst.msk [vmem:[%s1194_s28 + $0x8] sm:$0xff] %vm161_vm0, %v1076_v3  ;;  %165 = vst.msk [vmem:[%s1194_s28 + $0x18] sm:$0xff] %vm161_vm0, %v1076_v3  ;;  %v242_v30 = vld [vmem:[%s1184_s23 + $0x80] sm:$0xff]  ;;  %367 = vadd.xlane.f32.xlu1 %v366_v20  ;;  %v360_v31 = vadd.f32 %v359_v22, %v232_v19  ;;  %v249_v32 = vld [vmem:[%s1184_s23 + $0xb8] sm:$0xff] }
  0x3b   : > { %166 = vst.msk [vmem:[%s1194_s28 + $0x20] sm:$0xff] %vm161_vm0, %v1076_v3  ;;  %167 = vst.msk [vmem:[%s1194_s28 + $0x28] sm:$0xff] %vm161_vm0, %v1076_v3  ;;  %v243_v33 = vld [vmem:[%s1184_s23 + $0x88] sm:$0xff]  ;;  %v244_v34 = vld [vmem:[%s1184_s23 + $0x90] sm:$0xff]  ;;  %357 = vadd.xlane.f32.xlu0 %v356_v25  ;;  %v371_v35 = vadd.f32 %v370_v26, %v241_v21  ;;  %v380_v36 = vadd.f32 %v379_v29, %v248_v28 }
  0x3c   : > { %168 = vst.msk [vmem:[%s1194_s28 + $0x30] sm:$0xff] %vm161_vm0, %v1076_v3  ;;  %169 = vst.msk [vmem:[%s1194_s28 + $0x38] sm:$0xff] %vm161_vm0, %v1076_v3  ;;  %v374_v37 = vadd.f32 %v243_v33, %v242_v30  ;;  %v254_v38 = vld [vmem:[%s1184_s23 + $0xe0] sm:$0xff]  ;;  %v255_v39 = vld [vmem:[%s1184_s23 + $0xe8] sm:$0xff]  ;;  %v361_v41 = vadd.f32 %v360_v31, %v233_v27 }
  0x3d   : > { %170 = vst.msk [vmem:[%s1194_s28 + $0x40] sm:$0xff] %vm161_vm0, %v1076_v3  ;;  %171 = vst.msk [vmem:[%s1194_s28 + $0x48] sm:$0xff] %vm161_vm0, %v1076_v3  ;;  %v256_v40 = vld [vmem:[%s1184_s23 + $0xf0] sm:$0xff]  ;;  %v245_v42 = vld [vmem:[%s1184_s23 + $0x98] sm:$0xff]  ;;  %v389_v43 = vadd.f32 %v255_v39, %v254_v38  ;;  %v381_v50 = vadd.f32 %v380_v36, %v249_v32 }
  0x3e   : > { %172 = vst.msk [vmem:[%s1194_s28 + $0x50] sm:$0xff] %vm161_vm0, %v1076_v3  ;;  %173 = vst.msk [vmem:[%s1194_s28 + $0x58] sm:$0xff] %vm161_vm0, %v1076_v3  ;;  %v250_v44 = vld [vmem:[%s1184_s23 + $0xc0] sm:$0xff]  ;;  %v251_v45 = vld [vmem:[%s1184_s23 + $0xc8] sm:$0xff]  ;;  %v375_v46 = vadd.f32 %v374_v37, %v244_v34  ;;  %372 = vadd.xlane.f32.xlu1 %v371_v35 }
  0x3f   : > { %174 = vst.msk [vmem:[%s1194_s28 + $0x60] sm:$0xff] %vm161_vm0, %v1076_v3  ;;  %175 = vst.msk [vmem:[%s1194_s28 + $0x68] sm:$0xff] %vm161_vm0, %v1076_v3  ;;  %v252_v47 = vld [vmem:[%s1184_s23 + $0xd0] sm:$0xff]  ;;  %v384_v48 = vadd.f32 %v251_v45, %v250_v44  ;;  %v262_v49 = vld [vmem:[%s1184_s23 + $0x120] sm:$0xff]  ;;  %v390_v52 = vadd.f32 %v389_v43, %v256_v40  ;;  %362 = vadd.xlane.f32.xlu0 %v361_v41 }
  0x40   : > { %176 = vst.msk [vmem:[%s1194_s28 + $0x70] sm:$0xff] %vm161_vm0, %v1076_v3  ;;  %177 = vst.msk [vmem:[%s1194_s28 + $0x78] sm:$0xff] %vm161_vm0, %v1076_v3  ;;  %v257_v51 = vld [vmem:[%s1184_s23 + $0xf8] sm:$0xff]  ;;  %v263_v54 = vld [vmem:[%s1184_s23 + $0x128] sm:$0xff]  ;;  %v376_v55 = vadd.f32 %v375_v46, %v245_v42 }
  0x41   : > { %178 = vst.msk [vmem:[%s1194_s28 + $0x80] sm:$0xff] %vm161_vm0, %v1076_v3  ;;  %179 = vst.msk [vmem:[%s1194_s28 + $0x88] sm:$0xff] %vm161_vm0, %v1076_v3  ;;  %v253_v53 = vld [vmem:[%s1184_s23 + $0xd8] sm:$0xff]  ;;  %v385_v56 = vadd.f32 %v384_v48, %v252_v47  ;;  %v264_v57 = vld [vmem:[%s1184_s23 + $0x130] sm:$0xff]  ;;  %v399_v58 = vadd.f32 %v263_v54, %v262_v49  ;;  %v391_v2 = vadd.f32 %v390_v52, %v257_v51 }
  0x42   : > { %180 = vst.msk [vmem:[%s1194_s28 + $0x90] sm:$0xff] %vm161_vm0, %v1076_v3  ;;  %181 = vst.msk [vmem:[%s1194_s28 + $0x98] sm:$0xff] %vm161_vm0, %v1076_v3  ;;  %v258_v59 = vld [vmem:[%s1184_s23 + $0x100] sm:$0xff]  ;;  %v259_v60 = vld [vmem:[%s1184_s23 + $0x108] sm:$0xff]  ;;  %382 = vadd.xlane.f32.xlu1 %v381_v50 }
  0x43   : > { %182 = vst.msk [vmem:[%s1194_s28 + $0xa0] sm:$0xff] %vm161_vm0, %v1076_v3  ;;  %183 = vst.msk [vmem:[%s1194_s28 + $0xa8] sm:$0xff] %vm161_vm0, %v1076_v3  ;;  %v260_v61 = vld [vmem:[%s1184_s23 + $0x110] sm:$0xff]  ;;  %v394_v62 = vadd.f32 %v259_v60, %v258_v59  ;;  %v270_v63 = vld [vmem:[%s1184_s23 + $0x160] sm:$0xff]  ;;  %v400_v4 = vadd.f32 %v399_v58, %v264_v57  ;;  %377 = vadd.xlane.f32.xlu0 %v376_v55  ;;  %v386_v8 = vadd.f32 %v385_v56, %v253_v53 }
  0x44   : > { %184 = vst.msk [vmem:[%s1194_s28 + $0xb0] sm:$0xff] %vm161_vm0, %v1076_v3  ;;  %185 = vst.msk [vmem:[%s1194_s28 + $0xb8] sm:$0xff] %vm161_vm0, %v1076_v3  ;;  %v271_v0 = vld [vmem:[%s1184_s23 + $0x168] sm:$0xff]  ;;  %v266_v1 = vld [vmem:[%s1184_s23 + $0x140] sm:$0xff] }
  0x45   : > { %186 = vst.msk [vmem:[%s1194_s28 + $0xc0] sm:$0xff] %vm161_vm0, %v1076_v3  ;;  %187 = vst.msk [vmem:[%s1194_s28 + $0xc8] sm:$0xff] %vm161_vm0, %v1076_v3  ;;  %v261_v5 = vld [vmem:[%s1184_s23 + $0x118] sm:$0xff]  ;;  %v409_v6 = vadd.f32 %v271_v0, %v270_v63  ;;  %v267_v7 = vld [vmem:[%s1184_s23 + $0x148] sm:$0xff]  ;;  %v395_v9 = vadd.f32 %v394_v62, %v260_v61 }
  0x46   : > { %188 = vst.msk [vmem:[%s1194_s28 + $0xd0] sm:$0xff] %vm161_vm0, %v1076_v3  ;;  %189 = vst.msk [vmem:[%s1194_s28 + $0xd8] sm:$0xff] %vm161_vm0, %v1076_v3  ;;  %v272_v10 = vld [vmem:[%s1184_s23 + $0x170] sm:$0xff]  ;;  %v404_v11 = vadd.f32 %v267_v7, %v266_v1  ;;  %v278_v12 = vld [vmem:[%s1184_s23 + $0x1a0] sm:$0xff]  ;;  %392 = vadd.xlane.f32.xlu1 %v391_v2 }
  0x47   : > { %190 = vst.msk [vmem:[%s1194_s28 + $0xe0] sm:$0xff] %vm161_vm0, %v1076_v3  ;;  %191 = vst.msk [vmem:[%s1194_s28 + $0xe8] sm:$0xff] %vm161_vm0, %v1076_v3  ;;  %v279_v13 = vld [vmem:[%s1184_s23 + $0x1a8] sm:$0xff]  ;;  %v268_v14 = vld [vmem:[%s1184_s23 + $0x150] sm:$0xff]  ;;  %v410_v19 = vadd.f32 %v409_v6, %v272_v10  ;;  %387 = vadd.xlane.f32.xlu0 %v386_v8  ;;  %v396_v22 = vadd.f32 %v395_v9, %v261_v5 }
  0x48   : > { %192 = vst.msk [vmem:[%s1194_s28 + $0xf0] sm:$0xff] %vm161_vm0, %v1076_v3  ;;  %193 = vst.msk [vmem:[%s1194_s28 + $0xf8] sm:$0xff] %vm161_vm0, %v1076_v3  ;;  %v265_v3 = vld [vmem:[%s1184_s23 + $0x138] sm:$0xff]  ;;  %v274_v15 = vld [vmem:[%s1184_s23 + $0x180] sm:$0xff]  ;;  %v419_v21 = vadd.f32 %v279_v13, %v278_v12  ;;  %v405_v23 = vadd.f32 %v404_v11, %v268_v14 }
  0x49   : > { %v275_v16 = vld [vmem:[%s1184_s23 + $0x188] sm:$0xff]  ;;  %v401_v17 = vadd.f32 %v400_v4, %v265_v3  ;;  %v273_v18 = vld [vmem:[%s1184_s23 + $0x178] sm:$0xff]  ;;  %v280_v24 = vld [vmem:[%s1184_s23 + $0x1b0] sm:$0xff] }
  0x4a   : > { %v269_v20 = vld [vmem:[%s1184_s23 + $0x158] sm:$0xff]  ;;  %v414_v25 = vadd.f32 %v275_v16, %v274_v15  ;;  %v286_v26 = vld [vmem:[%s1184_s23 + $0x1e0] sm:$0xff]  ;;  %v287_v27 = vld [vmem:[%s1184_s23 + $0x1e8] sm:$0xff]  ;;  %v411_v31 = vadd.f32 %v410_v19, %v273_v18  ;;  %v420_v33 = vadd.f32 %v419_v21, %v280_v24 }
  0x4b   : > { %v276_v28 = vld [vmem:[%s1184_s23 + $0x190] sm:$0xff]  ;;  %v282_v29 = vld [vmem:[%s1184_s23 + $0x1c0] sm:$0xff]  ;;  %v283_v30 = vld [vmem:[%s1184_s23 + $0x1c8] sm:$0xff]  ;;  %402 = vadd.xlane.f32.xlu1 %v401_v17  ;;  %v429_v35 = vadd.f32 %v287_v27, %v286_v26  ;;  %397 = vadd.xlane.f32.xlu0 %v396_v22  ;;  %v406_v36 = vadd.f32 %v405_v23, %v269_v20 }
  0x4c   : > { %v281_v32 = vld [vmem:[%s1184_s23 + $0x1b8] sm:$0xff]  ;;  %v415_v37 = vadd.f32 %v414_v25, %v276_v28  ;;  %v288_v38 = vld [vmem:[%s1184_s23 + $0x1f0] sm:$0xff]  ;;  %v424_v39 = vadd.f32 %v283_v30, %v282_v29  ;;  %v294_v40 = vld [vmem:[%s1184_s23 + $0x220] sm:$0xff] }
  0x4d   : > { %v277_v34 = vld [vmem:[%s1184_s23 + $0x198] sm:$0xff]  ;;  %v295_v41 = vld [vmem:[%s1184_s23 + $0x228] sm:$0xff]  ;;  %v284_v42 = vld [vmem:[%s1184_s23 + $0x1d0] sm:$0xff]  ;;  %v421_v45 = vadd.f32 %v420_v33, %v281_v32  ;;  %v430_v47 = vadd.f32 %v429_v35, %v288_v38 }
  0x4e   : > { %v290_v43 = vld [vmem:[%s1184_s23 + $0x200] sm:$0xff]  ;;  %v291_v44 = vld [vmem:[%s1184_s23 + $0x208] sm:$0xff]  ;;  %v289_v46 = vld [vmem:[%s1184_s23 + $0x1f8] sm:$0xff]  ;;  %v439_v49 = vadd.f32 %v295_v41, %v294_v40  ;;  %v416_v50 = vadd.f32 %v415_v37, %v277_v34  ;;  %v425_v51 = vadd.f32 %v424_v39, %v284_v42 }
  0x4f   : > { %412 = vadd.xlane.f32.xlu1 %v411_v31  ;;  %v285_v48 = vld [vmem:[%s1184_s23 + $0x1d8] sm:$0xff]  ;;  %407 = vadd.xlane.f32.xlu0 %v406_v36  ;;  %v296_v52 = vld [vmem:[%s1184_s23 + $0x230] sm:$0xff]  ;;  %v434_v53 = vadd.f32 %v291_v44, %v290_v43  ;;  %v302_v54 = vld [vmem:[%s1184_s23 + $0x260] sm:$0xff]  ;;  %v431_v59 = vadd.f32 %v430_v47, %v289_v46 }
  0x50   : > { %v303_v55 = vld [vmem:[%s1184_s23 + $0x268] sm:$0xff]  ;;  %v292_v56 = vld [vmem:[%s1184_s23 + $0x210] sm:$0xff]  ;;  %v298_v57 = vld [vmem:[%s1184_s23 + $0x240] sm:$0xff]  ;;  %v440_v61 = vadd.f32 %v439_v49, %v296_v52  ;;  %v426_v0 = vadd.f32 %v425_v51, %v285_v48 }
  0x51   : > { %v299_v58 = vld [vmem:[%s1184_s23 + $0x248] sm:$0xff]  ;;  %v297_v60 = vld [vmem:[%s1184_s23 + $0x238] sm:$0xff]  ;;  %v449_v63 = vadd.f32 %v303_v55, %v302_v54  ;;  %v435_v1 = vadd.f32 %v434_v53, %v292_v56  ;;  %v304_v2 = vld [vmem:[%s1184_s23 + $0x270] sm:$0xff] }
  0x52   : > { %v293_v62 = vld [vmem:[%s1184_s23 + $0x218] sm:$0xff]  ;;  %v444_v3 = vadd.f32 %v299_v58, %v298_v57  ;;  %v310_v4 = vld [vmem:[%s1184_s23 + $0x2a0] sm:$0xff]  ;;  %v311_v5 = vld [vmem:[%s1184_s23 + $0x2a8] sm:$0xff]  ;;  %v441_v9 = vadd.f32 %v440_v61, %v297_v60 }
  0x53   : > { %422 = vadd.xlane.f32.xlu1 %v421_v45  ;;  %417 = vadd.xlane.f32.xlu0 %v416_v50  ;;  %v300_v6 = vld [vmem:[%s1184_s23 + $0x250] sm:$0xff]  ;;  %v306_v7 = vld [vmem:[%s1184_s23 + $0x280] sm:$0xff]  ;;  %v307_v8 = vld [vmem:[%s1184_s23 + $0x288] sm:$0xff]  ;;  %v450_v11 = vadd.f32 %v449_v63, %v304_v2  ;;  %v459_v13 = vadd.f32 %v311_v5, %v310_v4  ;;  %v436_v14 = vadd.f32 %v435_v1, %v293_v62 }
  0x54   : > { %v305_v10 = vld [vmem:[%s1184_s23 + $0x278] sm:$0xff]  ;;  %v445_v15 = vadd.f32 %v444_v3, %v300_v6  ;;  %v312_v16 = vld [vmem:[%s1184_s23 + $0x2b0] sm:$0xff]  ;;  %v454_v17 = vadd.f32 %v307_v8, %v306_v7  ;;  %v318_v18 = vld [vmem:[%s1184_s23 + $0x2e0] sm:$0xff] }
  0x55   : > { %v301_v12 = vld [vmem:[%s1184_s23 + $0x258] sm:$0xff]  ;;  %v319_v19 = vld [vmem:[%s1184_s23 + $0x2e8] sm:$0xff]  ;;  %v308_v20 = vld [vmem:[%s1184_s23 + $0x290] sm:$0xff]  ;;  %v451_v23 = vadd.f32 %v450_v11, %v305_v10  ;;  %v460_v25 = vadd.f32 %v459_v13, %v312_v16 }
  0x56   : > { %v314_v21 = vld [vmem:[%s1184_s23 + $0x2c0] sm:$0xff]  ;;  %v315_v22 = vld [vmem:[%s1184_s23 + $0x2c8] sm:$0xff]  ;;  %v313_v24 = vld [vmem:[%s1184_s23 + $0x2b8] sm:$0xff]  ;;  %v469_v27 = vadd.f32 %v319_v19, %v318_v18  ;;  %v446_v28 = vadd.f32 %v445_v15, %v301_v12  ;;  %v455_v29 = vadd.f32 %v454_v17, %v308_v20 }
  0x57   : > { %432 = vadd.xlane.f32.xlu1 %v431_v59  ;;  %427 = vadd.xlane.f32.xlu0 %v426_v0  ;;  %v309_v26 = vld [vmem:[%s1184_s23 + $0x298] sm:$0xff]  ;;  %v320_v30 = vld [vmem:[%s1184_s23 + $0x2f0] sm:$0xff]  ;;  %v464_v31 = vadd.f32 %v315_v22, %v314_v21  ;;  %v326_v32 = vld [vmem:[%s1184_s23 + $0x320] sm:$0xff]  ;;  %v461_v37 = vadd.f32 %v460_v25, %v313_v24 }
  0x58   : > { %v327_v33 = vld [vmem:[%s1184_s23 + $0x328] sm:$0xff]  ;;  %v316_v34 = vld [vmem:[%s1184_s23 + $0x2d0] sm:$0xff]  ;;  %v322_v35 = vld [vmem:[%s1184_s23 + $0x300] sm:$0xff]  ;;  %v470_v39 = vadd.f32 %v469_v27, %v320_v30  ;;  %v456_v42 = vadd.f32 %v455_v29, %v309_v26 }
  0x59   : > { %v323_v36 = vld [vmem:[%s1184_s23 + $0x308] sm:$0xff]  ;;  %v321_v38 = vld [vmem:[%s1184_s23 + $0x2f8] sm:$0xff]  ;;  %v479_v41 = vadd.f32 %v327_v33, %v326_v32  ;;  %v465_v43 = vadd.f32 %v464_v31, %v316_v34  ;;  %v328_v44 = vld [vmem:[%s1184_s23 + $0x330] sm:$0xff] }
  0x5a   : > { %v317_v40 = vld [vmem:[%s1184_s23 + $0x2d8] sm:$0xff]  ;;  %v474_v45 = vadd.f32 %v323_v36, %v322_v35  ;;  %v334_v46 = vld [vmem:[%s1184_s23 + $0x360] sm:$0xff]  ;;  %v335_v47 = vld [vmem:[%s1184_s23 + $0x368] sm:$0xff]  ;;  %v471_v51 = vadd.f32 %v470_v39, %v321_v38 }
  0x5b   : > { %442 = vadd.xlane.f32.xlu1 %v441_v9  ;;  %437 = vadd.xlane.f32.xlu0 %v436_v14  ;;  %v324_v48 = vld [vmem:[%s1184_s23 + $0x310] sm:$0xff]  ;;  %v330_v49 = vld [vmem:[%s1184_s23 + $0x340] sm:$0xff]  ;;  %v331_v50 = vld [vmem:[%s1184_s23 + $0x348] sm:$0xff]  ;;  %v480_v53 = vadd.f32 %v479_v41, %v328_v44  ;;  %v489_v55 = vadd.f32 %v335_v47, %v334_v46  ;;  %v466_v56 = vadd.f32 %v465_v43, %v317_v40 }
  0x5c   : > { %v329_v52 = vld [vmem:[%s1184_s23 + $0x338] sm:$0xff]  ;;  %v475_v57 = vadd.f32 %v474_v45, %v324_v48  ;;  %v336_v58 = vld [vmem:[%s1184_s23 + $0x370] sm:$0xff]  ;;  %v484_v59 = vadd.f32 %v331_v50, %v330_v49  ;;  %v342_v60 = vld [vmem:[%s1184_s23 + $0x3a0] sm:$0xff] }
  0x5d   : > { %v325_v54 = vld [vmem:[%s1184_s23 + $0x318] sm:$0xff]  ;;  %v343_v61 = vld [vmem:[%s1184_s23 + $0x3a8] sm:$0xff]  ;;  %v332_v62 = vld [vmem:[%s1184_s23 + $0x350] sm:$0xff]  ;;  %v481_v1 = vadd.f32 %v480_v53, %v329_v52  ;;  %v490_v3 = vadd.f32 %v489_v55, %v336_v58 }
  0x5e   : > { %v338_v63 = vld [vmem:[%s1184_s23 + $0x380] sm:$0xff]  ;;  %v339_v0 = vld [vmem:[%s1184_s23 + $0x388] sm:$0xff]  ;;  %v337_v2 = vld [vmem:[%s1184_s23 + $0x378] sm:$0xff]  ;;  %v499_v5 = vadd.f32 %v343_v61, %v342_v60  ;;  %v476_v6 = vadd.f32 %v475_v57, %v325_v54  ;;  %v485_v7 = vadd.f32 %v484_v59, %v332_v62 }
  0x5f   : > { %452 = vadd.xlane.f32.xlu1 %v451_v23  ;;  %447 = vadd.xlane.f32.xlu0 %v446_v28  ;;  %v333_v4 = vld [vmem:[%s1184_s23 + $0x358] sm:$0xff]  ;;  %v344_v8 = vld [vmem:[%s1184_s23 + $0x3b0] sm:$0xff]  ;;  %v494_v9 = vadd.f32 %v339_v0, %v338_v63  ;;  %v350_v10 = vld [vmem:[%s1184_s23 + $0x3e0] sm:$0xff]  ;;  %v491_v15 = vadd.f32 %v490_v3, %v337_v2 }
  0x60   : > { %v351_v11 = vld [vmem:[%s1184_s23 + $0x3e8] sm:$0xff]  ;;  %v340_v12 = vld [vmem:[%s1184_s23 + $0x390] sm:$0xff]  ;;  %v346_v13 = vld [vmem:[%s1184_s23 + $0x3c0] sm:$0xff]  ;;  %v500_v16 = vadd.f32 %v499_v5, %v344_v8  ;;  %v486_v18 = vadd.f32 %v485_v7, %v333_v4 }
  0x61   : > { %v347_v14 = vld [vmem:[%s1184_s23 + $0x3c8] sm:$0xff]  ;;  %v509_v17 = vadd.f32 %v351_v11, %v350_v10  ;;  %v345_v19 = vld [vmem:[%s1184_s23 + $0x3b8] sm:$0xff]  ;;  %v495_v20 = vadd.f32 %v494_v9, %v340_v12  ;;  %v352_v21 = vld [vmem:[%s1184_s23 + $0x3f0] sm:$0xff] }
  0x62   : > { %v504_v22 = vadd.f32 %v347_v14, %v346_v13  ;;  %v341_v23 = vld [vmem:[%s1184_s23 + $0x398] sm:$0xff]  ;;  %v348_v24 = vld [vmem:[%s1184_s23 + $0x3d0] sm:$0xff]  ;;  %v501_v25 = vadd.f32 %v500_v16, %v345_v19  ;;  %v194_v34 = vld [vmem:[%s1194_s28] sm:$0xff] }
  0x63   : > { %462 = vadd.xlane.f32.xlu1 %v461_v37  ;;  %457 = vadd.xlane.f32.xlu0 %v456_v42  ;;  %v510_v26 = vadd.f32 %v509_v17, %v352_v21  ;;  %v496_v27 = vadd.f32 %v495_v20, %v341_v23  ;;  %v353_v28 = vld [vmem:[%s1184_s23 + $0x3f8] sm:$0xff]  ;;  %v196_v33 = vld [vmem:[%s1194_s28 + $0x10] sm:$0xff]  ;;  %v195_v40 = vld [vmem:[%s1194_s28 + $0x8] sm:$0xff] }
  0x64   : > { %v505_v29 = vadd.f32 %v504_v22, %v348_v24  ;;  %v349_v30 = vld [vmem:[%s1184_s23 + $0x3d8] sm:$0xff]  ;;  %v199_v45 = vld [vmem:[%s1194_s28 + $0x28] sm:$0xff]  ;;  %v198_v46 = vld [vmem:[%s1194_s28 + $0x20] sm:$0xff] }
  0x65   : > { %v511_v31 = vadd.f32 %v510_v26, %v353_v28  ;;  %v197_v39 = vld [vmem:[%s1194_s28 + $0x18] sm:$0xff]  ;;  %v200_v55 = vld [vmem:[%s1194_s28 + $0x30] sm:$0xff]  ;;  %v203_v62 = vld [vmem:[%s1194_s28 + $0x48] sm:$0xff] }
  0x66   : > { %v506_v32 = vadd.f32 %v505_v29, %v349_v30  ;;  %v201_v52 = vld [vmem:[%s1194_s28 + $0x38] sm:$0xff]  ;;  %v204_v11 = vld [vmem:[%s1194_s28 + $0x50] sm:$0xff]  ;;  %v206_v22 = vld [vmem:[%s1194_s28 + $0x60] sm:$0xff] }
  0x67   : > { %472 = vadd.xlane.f32.xlu1 %v471_v51  ;;  %467 = vadd.xlane.f32.xlu0 %v466_v56  ;;  %v205_v8 = vld [vmem:[%s1194_s28 + $0x58] sm:$0xff] }
  0x6b   : > { %482 = vadd.xlane.f32.xlu1 %v481_v1  ;;  %477 = vadd.xlane.f32.xlu0 %v476_v6  ;;  %v202_v1 = vld [vmem:[%s1194_s28 + $0x40] sm:$0xff] }
  0x6f   : > { %492 = vadd.xlane.f32.xlu1 %v491_v15  ;;  %487 = vadd.xlane.f32.xlu0 %v486_v18  ;;  %v207_v18 = vld [vmem:[%s1194_s28 + $0x68] sm:$0xff] }
  0x73   : > { %502 = vadd.xlane.f32.xlu1 %v501_v25  ;;  %497 = vadd.xlane.f32.xlu0 %v496_v27 }
  0x77   : > { %512 = vadd.xlane.f32.xlu1 %v511_v31  ;;  %507 = vadd.xlane.f32.xlu0 %v506_v32  ;;  %v209_v32 = vld [vmem:[%s1194_s28 + $0x78] sm:$0xff] }
  0xc7   : > { %v368_v35 = vpop.xlane.xlu1 %367 }
  0xc8   : > { %v516_v36 = vadd.f32 %v368_v35, %v196_v33  ;;  %v358_v37 = vpop.xlane.xlu0 %357 }
  0xc9   : > { %v514_v38 = vadd.f32 %v358_v37, %v194_v34 }
  0xca   : > { %549 = vst.msk [vmem:[%s1194_s28 + $0x10] sm:$0xff] %vm161_vm0, %v516_v36  ;;  %v208_v36 = vld [vmem:[%s1194_s28 + $0x70] sm:$0xff] }
  0xcb   : > { %547 = vst.msk [vmem:[%s1194_s28] sm:$0xff] %vm161_vm0, %v514_v38  ;;  %v373_v41 = vpop.xlane.xlu1 %372 }
  0xcc   : > { %v517_v42 = vadd.f32 %v373_v41, %v197_v39  ;;  %v363_v43 = vpop.xlane.xlu0 %362 }
  0xcd   : > { %v515_v44 = vadd.f32 %v363_v43, %v195_v40 }
  0xce   : > { %550 = vst.msk [vmem:[%s1194_s28 + $0x18] sm:$0xff] %vm161_vm0, %v517_v42 }
  0xcf   : > { %548 = vst.msk [vmem:[%s1194_s28 + $0x8] sm:$0xff] %vm161_vm0, %v515_v44  ;;  %v383_v47 = vpop.xlane.xlu1 %382 }
  0xd0   : > { %v519_v48 = vadd.f32 %v383_v47, %v199_v45  ;;  %v378_v49 = vpop.xlane.xlu0 %377 }
  0xd1   : > { %v584_v50 = vld [vmem:[%s1194_s28 + $0x10] sm:$0xff]  ;;  %v518_v51 = vadd.f32 %v378_v49, %v198_v46  ;;  %v211_v46 = vld [vmem:[%s1194_s28 + $0x88] sm:$0xff] }
  0xd2   : > { %v616_v53 = vadd.f32 1.0, %v584_v50  ;;  %v582_v54 = vld [vmem:[%s1194_s28] sm:$0xff]  ;;  %552 = vst.msk [vmem:[%s1194_s28 + $0x28] sm:$0xff] %vm161_vm0, %v519_v48 }
  0xd3   : > { %v614_v56 = vadd.f32 1.0, %v582_v54  ;;  %551 = vst.msk [vmem:[%s1194_s28 + $0x20] sm:$0xff] %vm161_vm0, %v518_v51  ;;  %v393_v57 = vpop.xlane.xlu1 %392  ;;  %v210_v50 = vld [vmem:[%s1194_s28 + $0x80] sm:$0xff] }
  0xd4   : > { %927 = vrsqrt.f32 %v616_v53  ;;  %v521_v58 = vadd.f32 %v393_v57, %v201_v52  ;;  %v388_v59 = vpop.xlane.xlu0 %387  ;;  %vm648_vm1 = vcmp.gt.f32.partialorder %v616_v53, 0.0 }
  0xd5   : > { %929 = vrsqrt.f32 %v614_v56  ;;  %v585_v60 = vld [vmem:[%s1194_s28 + $0x18] sm:$0xff]  ;;  %v520_v61 = vadd.f32 %v388_v59, %v200_v55  ;;  %vm646_vm2 = vcmp.gt.f32.partialorder %v614_v56, 0.0 }
  0xd6   : > { %v617_v63 = vadd.f32 1.0, %v585_v60  ;;  %v583_v0 = vld [vmem:[%s1194_s28 + $0x8] sm:$0xff]  ;;  %554 = vst.msk [vmem:[%s1194_s28 + $0x38] sm:$0xff] %vm161_vm0, %v521_v58  ;;  %v213_v60 = vld [vmem:[%s1194_s28 + $0x98] sm:$0xff] }
  0xd7   : > { %v615_v2 = vadd.f32 1.0, %v583_v0  ;;  %553 = vst.msk [vmem:[%s1194_s28 + $0x30] sm:$0xff] %vm161_vm0, %v520_v61  ;;  %v212_v0 = vld [vmem:[%s1194_s28 + $0x90] sm:$0xff] }
  0xd8   : > { %v403_v3 = vpop.xlane.xlu1 %402  ;;  %931 = vrsqrt.f32 %v617_v63  ;;  %v398_v5 = vpop.xlane.xlu0 %397  ;;  %vm649_vm3 = vcmp.gt.f32.partialorder %v617_v63, 0.0 }
  0xd9   : > { %v523_v4 = vadd.f32 %v403_v3, %v203_v62  ;;  %933 = vrsqrt.f32 %v615_v2  ;;  %v587_v6 = vld [vmem:[%s1194_s28 + $0x28] sm:$0xff]  ;;  %v522_v7 = vadd.f32 %v398_v5, %v202_v1  ;;  %vm647_vm4 = vcmp.gt.f32.partialorder %v615_v2, 0.0 }
  0xda   : > { %v1420_v9 = vadd.f32 1.0, %v587_v6  ;;  %v586_v10 = vld [vmem:[%s1194_s28 + $0x20] sm:$0xff] }
  0xdb   : > { %556 = vst.msk [vmem:[%s1194_s28 + $0x48] sm:$0xff] %vm161_vm0, %v523_v4  ;;  %v1426_v12 = vadd.f32 1.0, %v586_v10  ;;  %555 = vst.msk [vmem:[%s1194_s28 + $0x40] sm:$0xff] %vm161_vm0, %v522_v7  ;;  %v215_v10 = vld [vmem:[%s1194_s28 + $0xa8] sm:$0xff] }
  0xdc   : > { %v413_v13 = vpop.xlane.xlu1 %412  ;;  %935 = vrsqrt.f32 %v1420_v9  ;;  %v408_v15 = vpop.xlane.xlu0 %407  ;;  %vm651_vm5 = vcmp.gt.f32.partialorder %v1420_v9, 0.0 }
  0xdd   : > { %v525_v14 = vadd.f32 %v413_v13, %v205_v8  ;;  %937 = vrsqrt.f32 %v1426_v12  ;;  %v589_v16 = vld [vmem:[%s1194_s28 + $0x38] sm:$0xff]  ;;  %v524_v17 = vadd.f32 %v408_v15, %v204_v11  ;;  %vm650_vm6 = vcmp.gt.f32.partialorder %v1426_v12, 0.0 }
  0xde   : > { %v928_v19 = vpop.eup %927  ;;  %v1434_v20 = vadd.f32 1.0, %v589_v16  ;;  %v588_v21 = vld [vmem:[%s1194_s28 + $0x30] sm:$0xff] }
  0xdf   : > { %558 = vst.msk [vmem:[%s1194_s28 + $0x58] sm:$0xff] %vm161_vm0, %v525_v14  ;;  %v930_v23 = vpop.eup %929  ;;  %v712_v24 = vsel %vm648_vm1, %v928_v19, 0.0  ;;  %v1440_v25 = vadd.f32 1.0, %v588_v21  ;;  %557 = vst.msk [vmem:[%s1194_s28 + $0x50] sm:$0xff] %vm161_vm0, %v524_v17  ;;  %v214_v14 = vld [vmem:[%s1194_s28 + $0xa0] sm:$0xff] }
  0xe0   : > { %v423_v26 = vpop.xlane.xlu1 %422  ;;  %744 = vst.msk [vmem:[%s1194_s28 + $0x10] sm:$0xff] %vm161_vm0, %v712_v24  ;;  %v710_v27 = vsel %vm646_vm2, %v930_v23, 0.0  ;;  %939 = vrsqrt.f32 %v1434_v20  ;;  %v418_v29 = vpop.xlane.xlu0 %417  ;;  %vm653_vm7 = vcmp.gt.f32.partialorder %v1434_v20, 0.0  ;;  %v217_v24 = vld [vmem:[%s1194_s28 + $0xb8] sm:$0xff] }
  0xe1   : > { %v527_v28 = vadd.f32 %v423_v26, %v207_v18  ;;  %742 = vst.msk [vmem:[%s1194_s28] sm:$0xff] %vm161_vm0, %v710_v27  ;;  %941 = vrsqrt.f32 %v1440_v25  ;;  %v526_v31 = vadd.f32 %v418_v29, %v206_v22  ;;  %vm652_vm8 = vcmp.gt.f32.partialorder %v1440_v25, 0.0 }
  0xe2   : > { %v591_v30 = vld [vmem:[%s1194_s28 + $0x48] sm:$0xff]  ;;  %v932_v33 = vpop.eup %931  ;;  %v590_v35 = vld [vmem:[%s1194_s28 + $0x40] sm:$0xff] }
  0xe3   : > { %v1452_v34 = vadd.f32 1.0, %v591_v30  ;;  %560 = vst.msk [vmem:[%s1194_s28 + $0x68] sm:$0xff] %vm161_vm0, %v527_v28  ;;  %v934_v37 = vpop.eup %933  ;;  %v713_v38 = vsel %vm649_vm3, %v932_v33, 0.0  ;;  %v1458_v39 = vadd.f32 1.0, %v590_v35  ;;  %559 = vst.msk [vmem:[%s1194_s28 + $0x60] sm:$0xff] %vm161_vm0, %v526_v31  ;;  %v216_v28 = vld [vmem:[%s1194_s28 + $0xb0] sm:$0xff] }
  0xe4   : > { %v433_v40 = vpop.xlane.xlu1 %432  ;;  %745 = vst.msk [vmem:[%s1194_s28 + $0x18] sm:$0xff] %vm161_vm0, %v713_v38  ;;  %v711_v41 = vsel %vm647_vm4, %v934_v37, 0.0  ;;  %v428_v43 = vpop.xlane.xlu0 %427  ;;  %v219_v38 = vld [vmem:[%s1194_s28 + $0xc8] sm:$0xff] }
  0xe5   : > { %943 = vrsqrt.f32 %v1452_v34  ;;  %v529_v42 = vadd.f32 %v433_v40, %v209_v32  ;;  %743 = vst.msk [vmem:[%s1194_s28 + $0x8] sm:$0xff] %vm161_vm0, %v711_v41  ;;  %v528_v45 = vadd.f32 %v428_v43, %v208_v36  ;;  %vm655_vm9 = vcmp.gt.f32.partialorder %v1452_v34, 0.0 }
  0xe6   : > { %945 = vrsqrt.f32 %v1458_v39  ;;  %v593_v44 = vld [vmem:[%s1194_s28 + $0x58] sm:$0xff]  ;;  %v936_v47 = vpop.eup %935  ;;  %v592_v49 = vld [vmem:[%s1194_s28 + $0x50] sm:$0xff]  ;;  %vm654_vm10 = vcmp.gt.f32.partialorder %v1458_v39, 0.0 }
  0xe7   : > { %v1471_v48 = vadd.f32 1.0, %v593_v44  ;;  %562 = vst.msk [vmem:[%s1194_s28 + $0x78] sm:$0xff] %vm161_vm0, %v529_v42  ;;  %v938_v51 = vpop.eup %937  ;;  %v715_v52 = vsel %vm651_vm5, %v936_v47, 0.0  ;;  %v1478_v53 = vadd.f32 1.0, %v592_v49  ;;  %561 = vst.msk [vmem:[%s1194_s28 + $0x70] sm:$0xff] %vm161_vm0, %v528_v45  ;;  %v218_v42 = vld [vmem:[%s1194_s28 + $0xc0] sm:$0xff] }
  0xe8   : > { %v443_v54 = vpop.xlane.xlu1 %442  ;;  %747 = vst.msk [vmem:[%s1194_s28 + $0x28] sm:$0xff] %vm161_vm0, %v715_v52  ;;  %v714_v55 = vsel %vm650_vm6, %v938_v51, 0.0  ;;  %v438_v57 = vpop.xlane.xlu0 %437  ;;  %v221_v52 = vld [vmem:[%s1194_s28 + $0xd8] sm:$0xff] }
  0xe9   : > { %947 = vrsqrt.f32 %v1471_v48  ;;  %v531_v56 = vadd.f32 %v443_v54, %v211_v46  ;;  %746 = vst.msk [vmem:[%s1194_s28 + $0x20] sm:$0xff] %vm161_vm0, %v714_v55  ;;  %v530_v59 = vadd.f32 %v438_v57, %v210_v50  ;;  %vm657_vm11 = vcmp.gt.f32.partialorder %v1471_v48, 0.0 }
  0xea   : > { %949 = vrsqrt.f32 %v1478_v53  ;;  %v595_v58 = vld [vmem:[%s1194_s28 + $0x68] sm:$0xff]  ;;  %v940_v61 = vpop.eup %939  ;;  %v594_v63 = vld [vmem:[%s1194_s28 + $0x60] sm:$0xff]  ;;  %vm656_vm12 = vcmp.gt.f32.partialorder %v1478_v53, 0.0 }
  0xeb   : > { %v1491_v62 = vadd.f32 1.0, %v595_v58  ;;  %564 = vst.msk [vmem:[%s1194_s28 + $0x88] sm:$0xff] %vm161_vm0, %v531_v56  ;;  %v942_v1 = vpop.eup %941  ;;  %v717_v2 = vsel %vm653_vm7, %v940_v61, 0.0  ;;  %v1498_v3 = vadd.f32 1.0, %v594_v63  ;;  %563 = vst.msk [vmem:[%s1194_s28 + $0x80] sm:$0xff] %vm161_vm0, %v530_v59  ;;  %v220_v56 = vld [vmem:[%s1194_s28 + $0xd0] sm:$0xff] }
  0xec   : > { %v453_v4 = vpop.xlane.xlu1 %452  ;;  %749 = vst.msk [vmem:[%s1194_s28 + $0x38] sm:$0xff] %vm161_vm0, %v717_v2  ;;  %v716_v5 = vsel %vm652_vm8, %v942_v1, 0.0  ;;  %v448_v7 = vpop.xlane.xlu0 %447  ;;  %v223_v2 = vld [vmem:[%s1194_s28 + $0xe8] sm:$0xff] }
  0xed   : > { %951 = vrsqrt.f32 %v1491_v62  ;;  %v533_v6 = vadd.f32 %v453_v4, %v213_v60  ;;  %748 = vst.msk [vmem:[%s1194_s28 + $0x30] sm:$0xff] %vm161_vm0, %v716_v5  ;;  %v532_v9 = vadd.f32 %v448_v7, %v212_v0  ;;  %vm659_vm13 = vcmp.gt.f32.partialorder %v1491_v62, 0.0 }
  0xee   : > { %953 = vrsqrt.f32 %v1498_v3  ;;  %v597_v8 = vld [vmem:[%s1194_s28 + $0x78] sm:$0xff]  ;;  %v596_v13 = vld [vmem:[%s1194_s28 + $0x70] sm:$0xff]  ;;  %vm658_vm14 = vcmp.gt.f32.partialorder %v1498_v3, 0.0 }
  0xef   : > { %v944_v11 = vpop.eup %943  ;;  %v1511_v12 = vadd.f32 1.0, %v597_v8  ;;  %566 = vst.msk [vmem:[%s1194_s28 + $0x98] sm:$0xff] %vm161_vm0, %v533_v6  ;;  %v1518_v17 = vadd.f32 1.0, %v596_v13  ;;  %565 = vst.msk [vmem:[%s1194_s28 + $0x90] sm:$0xff] %vm161_vm0, %v532_v9  ;;  %v222_v6 = vld [vmem:[%s1194_s28 + $0xe0] sm:$0xff] }
  0xf0   : > { %v946_v15 = vpop.eup %945  ;;  %v719_v16 = vsel %vm655_vm9, %v944_v11, 0.0  ;;  %v463_v18 = vpop.xlane.xlu1 %462 }
  0xf1   : > { %751 = vst.msk [vmem:[%s1194_s28 + $0x48] sm:$0xff] %vm161_vm0, %v719_v16  ;;  %v718_v19 = vsel %vm654_vm10, %v946_v15, 0.0  ;;  %955 = vrsqrt.f32 %v1511_v12  ;;  %v535_v20 = vadd.f32 %v463_v18, %v215_v10  ;;  %v458_v21 = vpop.xlane.xlu0 %457  ;;  %vm661_vm15 = vcmp.gt.f32.partialorder %v1511_v12, 0.0  ;;  %v225_v16 = vld [vmem:[%s1194_s28 + $0xf8] sm:$0xff] }
  0xf2   : > { %750 = vst.msk [vmem:[%s1194_s28 + $0x40] sm:$0xff] %vm161_vm0, %v718_v19  ;;  %957 = vrsqrt.f32 %v1518_v17  ;;  %v599_v22 = vld [vmem:[%s1194_s28 + $0x88] sm:$0xff]  ;;  %v534_v23 = vadd.f32 %v458_v21, %v214_v14  ;;  %v598_v27 = vld [vmem:[%s1194_s28 + $0x80] sm:$0xff]  ;;  %vm660_vm1 = vcmp.gt.f32.partialorder %v1518_v17, 0.0 }
  0xf3   : > { %v948_v25 = vpop.eup %947  ;;  %v1531_v26 = vadd.f32 1.0, %v599_v22  ;;  %568 = vst.msk [vmem:[%s1194_s28 + $0xa8] sm:$0xff] %vm161_vm0, %v535_v20  ;;  %v1538_v31 = vadd.f32 1.0, %v598_v27  ;;  %v224_v20 = vld [vmem:[%s1194_s28 + $0xf0] sm:$0xff] }
  0xf4   : > { %v950_v29 = vpop.eup %949  ;;  %v721_v30 = vsel %vm657_vm11, %v948_v25, 0.0  ;;  %567 = vst.msk [vmem:[%s1194_s28 + $0xa0] sm:$0xff] %vm161_vm0, %v534_v23  ;;  %v473_v32 = vpop.xlane.xlu1 %472 }
  0xf5   : > { %753 = vst.msk [vmem:[%s1194_s28 + $0x58] sm:$0xff] %vm161_vm0, %v721_v30  ;;  %v720_v33 = vsel %vm656_vm12, %v950_v29, 0.0  ;;  %959 = vrsqrt.f32 %v1531_v26  ;;  %v537_v34 = vadd.f32 %v473_v32, %v217_v24  ;;  %v468_v35 = vpop.xlane.xlu0 %467  ;;  %vm663_vm2 = vcmp.gt.f32.partialorder %v1531_v26, 0.0 }
  0xf6   : > { %752 = vst.msk [vmem:[%s1194_s28 + $0x50] sm:$0xff] %vm161_vm0, %v720_v33  ;;  %961 = vrsqrt.f32 %v1538_v31  ;;  %v601_v36 = vld [vmem:[%s1194_s28 + $0x98] sm:$0xff]  ;;  %v536_v37 = vadd.f32 %v468_v35, %v216_v28  ;;  %v600_v41 = vld [vmem:[%s1194_s28 + $0x90] sm:$0xff]  ;;  %vm662_vm3 = vcmp.gt.f32.partialorder %v1538_v31, 0.0 }
  0xf7   : > { %v952_v39 = vpop.eup %951  ;;  %v1551_v40 = vadd.f32 1.0, %v601_v36  ;;  %570 = vst.msk [vmem:[%s1194_s28 + $0xb8] sm:$0xff] %vm161_vm0, %v537_v34  ;;  %v1558_v45 = vadd.f32 1.0, %v600_v41 }
  0xf8   : > { %v954_v43 = vpop.eup %953  ;;  %v723_v44 = vsel %vm659_vm13, %v952_v39, 0.0  ;;  %569 = vst.msk [vmem:[%s1194_s28 + $0xb0] sm:$0xff] %vm161_vm0, %v536_v37  ;;  %v483_v46 = vpop.xlane.xlu1 %482 }
  0xf9   : > { %755 = vst.msk [vmem:[%s1194_s28 + $0x68] sm:$0xff] %vm161_vm0, %v723_v44  ;;  %v722_v47 = vsel %vm658_vm14, %v954_v43, 0.0  ;;  %963 = vrsqrt.f32 %v1551_v40  ;;  %v539_v48 = vadd.f32 %v483_v46, %v219_v38  ;;  %v478_v49 = vpop.xlane.xlu0 %477  ;;  %vm665_vm4 = vcmp.gt.f32.partialorder %v1551_v40, 0.0 }
  0xfa   : > { %754 = vst.msk [vmem:[%s1194_s28 + $0x60] sm:$0xff] %vm161_vm0, %v722_v47  ;;  %965 = vrsqrt.f32 %v1558_v45  ;;  %v603_v50 = vld [vmem:[%s1194_s28 + $0xa8] sm:$0xff]  ;;  %v538_v51 = vadd.f32 %v478_v49, %v218_v42  ;;  %vm664_vm5 = vcmp.gt.f32.partialorder %v1558_v45, 0.0 }
  0xfb   : > { %v956_v53 = vpop.eup %955  ;;  %v1571_v54 = vadd.f32 1.0, %v603_v50  ;;  %v602_v55 = vld [vmem:[%s1194_s28 + $0xa0] sm:$0xff]  ;;  %572 = vst.msk [vmem:[%s1194_s28 + $0xc8] sm:$0xff] %vm161_vm0, %v539_v48 }
  0xfc   : > { %v958_v57 = vpop.eup %957  ;;  %v725_v58 = vsel %vm661_vm15, %v956_v53, 0.0  ;;  %v1578_v59 = vadd.f32 1.0, %v602_v55  ;;  %571 = vst.msk [vmem:[%s1194_s28 + $0xc0] sm:$0xff] %vm161_vm0, %v538_v51  ;;  %v493_v60 = vpop.xlane.xlu1 %492 }
  0xfd   : > { %757 = vst.msk [vmem:[%s1194_s28 + $0x78] sm:$0xff] %vm161_vm0, %v725_v58  ;;  %v724_v61 = vsel %vm660_vm1, %v958_v57, 0.0  ;;  %967 = vrsqrt.f32 %v1571_v54  ;;  %v541_v62 = vadd.f32 %v493_v60, %v221_v52  ;;  %v488_v63 = vpop.xlane.xlu0 %487  ;;  %vm667_vm6 = vcmp.gt.f32.partialorder %v1571_v54, 0.0 }
  0xfe   : > { %756 = vst.msk [vmem:[%s1194_s28 + $0x70] sm:$0xff] %vm161_vm0, %v724_v61  ;;  %969 = vrsqrt.f32 %v1578_v59  ;;  %v605_v0 = vld [vmem:[%s1194_s28 + $0xb8] sm:$0xff]  ;;  %v540_v1 = vadd.f32 %v488_v63, %v220_v56  ;;  %vm666_vm7 = vcmp.gt.f32.partialorder %v1578_v59, 0.0 }
  0xff   : > { %v960_v3 = vpop.eup %959  ;;  %v1591_v4 = vadd.f32 1.0, %v605_v0  ;;  %v604_v5 = vld [vmem:[%s1194_s28 + $0xb0] sm:$0xff]  ;;  %574 = vst.msk [vmem:[%s1194_s28 + $0xd8] sm:$0xff] %vm161_vm0, %v541_v62 }
 0x100   : > { %v962_v7 = vpop.eup %961  ;;  %v727_v8 = vsel %vm663_vm2, %v960_v3, 0.0  ;;  %v636_v9 = vadd.f32 1.0, %v604_v5  ;;  %573 = vst.msk [vmem:[%s1194_s28 + $0xd0] sm:$0xff] %vm161_vm0, %v540_v1  ;;  %v503_v10 = vpop.xlane.xlu1 %502 }
 0x101   : > { %759 = vst.msk [vmem:[%s1194_s28 + $0x88] sm:$0xff] %vm161_vm0, %v727_v8  ;;  %v726_v11 = vsel %vm662_vm3, %v962_v7, 0.0  ;;  %971 = vrsqrt.f32 %v1591_v4  ;;  %v543_v12 = vadd.f32 %v503_v10, %v223_v2  ;;  %v498_v13 = vpop.xlane.xlu0 %497  ;;  %vm669_vm8 = vcmp.gt.f32.partialorder %v1591_v4, 0.0 }
 0x102   : > { %758 = vst.msk [vmem:[%s1194_s28 + $0x80] sm:$0xff] %vm161_vm0, %v726_v11  ;;  %973 = vrsqrt.f32 %v636_v9  ;;  %v607_v14 = vld [vmem:[%s1194_s28 + $0xc8] sm:$0xff]  ;;  %v542_v15 = vadd.f32 %v498_v13, %v222_v6  ;;  %vm668_vm9 = vcmp.gt.f32.partialorder %v636_v9, 0.0 }
 0x103   : > { %v964_v17 = vpop.eup %963  ;;  %v639_v18 = vadd.f32 1.0, %v607_v14  ;;  %v606_v19 = vld [vmem:[%s1194_s28 + $0xc0] sm:$0xff]  ;;  %576 = vst.msk [vmem:[%s1194_s28 + $0xe8] sm:$0xff] %vm161_vm0, %v543_v12 }
 0x104   : > { %v966_v21 = vpop.eup %965  ;;  %v729_v22 = vsel %vm665_vm4, %v964_v17, 0.0  ;;  %v638_v23 = vadd.f32 1.0, %v606_v19  ;;  %575 = vst.msk [vmem:[%s1194_s28 + $0xe0] sm:$0xff] %vm161_vm0, %v542_v15  ;;  %v513_v24 = vpop.xlane.xlu1 %512 }
 0x105   : > { %761 = vst.msk [vmem:[%s1194_s28 + $0x98] sm:$0xff] %vm161_vm0, %v729_v22  ;;  %v728_v25 = vsel %vm664_vm5, %v966_v21, 0.0  ;;  %975 = vrsqrt.f32 %v639_v18  ;;  %v545_v26 = vadd.f32 %v513_v24, %v225_v16  ;;  %v508_v27 = vpop.xlane.xlu0 %507  ;;  %vm671_vm10 = vcmp.gt.f32.partialorder %v639_v18, 0.0 }
 0x106   : > { %760 = vst.msk [vmem:[%s1194_s28 + $0x90] sm:$0xff] %vm161_vm0, %v728_v25  ;;  %977 = vrsqrt.f32 %v638_v23  ;;  %v609_v28 = vld [vmem:[%s1194_s28 + $0xd8] sm:$0xff]  ;;  %v544_v29 = vadd.f32 %v508_v27, %v224_v20  ;;  %vm670_vm11 = vcmp.gt.f32.partialorder %v638_v23, 0.0 }
 0x107   : > { %v968_v30 = vpop.eup %967  ;;  %v641_v31 = vadd.f32 1.0, %v609_v28  ;;  %v608_v32 = vld [vmem:[%s1194_s28 + $0xd0] sm:$0xff]  ;;  %578 = vst.msk [vmem:[%s1194_s28 + $0xf8] sm:$0xff] %vm161_vm0, %v545_v26 }
 0x108   : > { %v970_v33 = vpop.eup %969  ;;  %v731_v34 = vsel %vm667_vm6, %v968_v30, 0.0  ;;  %v640_v35 = vadd.f32 1.0, %v608_v32  ;;  %577 = vst.msk [vmem:[%s1194_s28 + $0xf0] sm:$0xff] %vm161_vm0, %v544_v29 }
 0x109   : > { %763 = vst.msk [vmem:[%s1194_s28 + $0xa8] sm:$0xff] %vm161_vm0, %v731_v34  ;;  %v730_v36 = vsel %vm666_vm7, %v970_v33, 0.0  ;;  %979 = vrsqrt.f32 %v641_v31  ;;  %vm673_vm12 = vcmp.gt.f32.partialorder %v641_v31, 0.0 }
 0x10a   : > { %762 = vst.msk [vmem:[%s1194_s28 + $0xa0] sm:$0xff] %vm161_vm0, %v730_v36  ;;  %981 = vrsqrt.f32 %v640_v35  ;;  %v611_v37 = vld [vmem:[%s1194_s28 + $0xe8] sm:$0xff]  ;;  %vm672_vm13 = vcmp.gt.f32.partialorder %v640_v35, 0.0 }
 0x10b   : > { %v972_v38 = vpop.eup %971  ;;  %v643_v39 = vadd.f32 1.0, %v611_v37  ;;  %v610_v40 = vld [vmem:[%s1194_s28 + $0xe0] sm:$0xff] }
 0x10c   : > { %v974_v41 = vpop.eup %973  ;;  %v733_v42 = vsel %vm669_vm8, %v972_v38, 0.0  ;;  %v642_v43 = vadd.f32 1.0, %v610_v40 }
 0x10d   : > { %765 = vst.msk [vmem:[%s1194_s28 + $0xb8] sm:$0xff] %vm161_vm0, %v733_v42  ;;  %v732_v44 = vsel %vm668_vm9, %v974_v41, 0.0  ;;  %983 = vrsqrt.f32 %v643_v39  ;;  %vm675_vm14 = vcmp.gt.f32.partialorder %v643_v39, 0.0 }
 0x10e   : > { %764 = vst.msk [vmem:[%s1194_s28 + $0xb0] sm:$0xff] %vm161_vm0, %v732_v44  ;;  %985 = vrsqrt.f32 %v642_v43  ;;  %v613_v45 = vld [vmem:[%s1194_s28 + $0xf8] sm:$0xff]  ;;  %vm674_vm15 = vcmp.gt.f32.partialorder %v642_v43, 0.0 }
 0x10f   : > { %v976_v46 = vpop.eup %975  ;;  %v645_v47 = vadd.f32 1.0, %v613_v45  ;;  %v612_v48 = vld [vmem:[%s1194_s28 + $0xf0] sm:$0xff] }
 0x110   : > { %v978_v49 = vpop.eup %977  ;;  %v735_v50 = vsel %vm671_vm10, %v976_v46, 0.0  ;;  %v644_v51 = vadd.f32 1.0, %v612_v48 }
 0x111   : > { %767 = vst.msk [vmem:[%s1194_s28 + $0xc8] sm:$0xff] %vm161_vm0, %v735_v50  ;;  %v734_v52 = vsel %vm670_vm11, %v978_v49, 0.0  ;;  %987 = vrsqrt.f32 %v645_v47  ;;  %vm677_vm1 = vcmp.gt.f32.partialorder %v645_v47, 0.0 }
 0x112   : > { %766 = vst.msk [vmem:[%s1194_s28 + $0xc0] sm:$0xff] %vm161_vm0, %v734_v52  ;;  %989 = vrsqrt.f32 %v644_v51  ;;  %vm676_vm2 = vcmp.gt.f32.partialorder %v644_v51, 0.0 }
 0x113   : > { %v980_v53 = vpop.eup %979 }
 0x114   : > { %v982_v54 = vpop.eup %981  ;;  %v737_v55 = vsel %vm673_vm12, %v980_v53, 0.0 }
 0x115   : > { %769 = vst.msk [vmem:[%s1194_s28 + $0xd8] sm:$0xff] %vm161_vm0, %v737_v55  ;;  %v736_v56 = vsel %vm672_vm13, %v982_v54, 0.0 }
 0x116   : > { %768 = vst.msk [vmem:[%s1194_s28 + $0xd0] sm:$0xff] %vm161_vm0, %v736_v56 }
 0x117   : > { %v984_v57 = vpop.eup %983 }
 0x118   : > { %v986_v58 = vpop.eup %985  ;;  %v739_v59 = vsel %vm675_vm14, %v984_v57, 0.0 }
 0x119   : > { %771 = vst.msk [vmem:[%s1194_s28 + $0xe8] sm:$0xff] %vm161_vm0, %v739_v59  ;;  %v738_v60 = vsel %vm674_vm15, %v986_v58, 0.0 }
 0x11a   : > { %770 = vst.msk [vmem:[%s1194_s28 + $0xe0] sm:$0xff] %vm161_vm0, %v738_v60 }
 0x11b   : > { %v988_v61 = vpop.eup %987 }
 0x11c   : > { %v990_v62 = vpop.eup %989  ;;  %v741_v63 = vsel %vm677_vm1, %v988_v61, 0.0 }
 0x11d   : > { %773 = vst.msk [vmem:[%s1194_s28 + $0xf8] sm:$0xff] %vm161_vm0, %v741_v63  ;;  %v740_v0 = vsel %vm676_vm2, %v990_v62, 0.0 }
 0x11e   : > { %772 = vst.msk [vmem:[%s1194_s28 + $0xf0] sm:$0xff] %vm161_vm0, %v740_v0 }
 0x11f PF: > { %s14_s11 = sadd.s32 1, %s1071_s11   ;;  %s1679_s6 = smov %s1055_s7 }
 0x120   : > { %p11_p7 = scmp.ge.s32.totalorder %s14_s11, 4   ;;  %s1680_s7 = smov %s1059_s8 }
 0x121   : > { %s1681_s8 = smov %s1136_s18  ;;  %s1682_s9 = smov %s1067_s10 }
 0x122   : > { %s1683_s10 = smov %s1685_s13  ;;  %13 = sbr.rel (!%p11_p7) target bundleno = 4 (0x4), region = 72 }
 0x129   :  { %796 = vsyncpa [#allocation3], 1 }
 0x12a   :  { %798 = vsyncpa [#allocation3 + $0x1], 1 }

</bundles_post_ra>
